<compile_context>
chip_gen: v6e
topology: v6e:2x2x1
jax: 0.10.0
libtpu: 0.0.40
codegen_flags: <defaults>
</compile_context>

<pallas_src>
import jax
import jax.numpy as jnp
from jax.experimental import pallas as pl
from jax.experimental.pallas import tpu as pltpu


def _round_up(x, m):
    return ((x + m - 1) // m) * m


# ---------------------------------------------------------------------------
# Pallas kernels:  O = W @ P (+ bias), K-grid accumulation in fp32 VMEM
# ---------------------------------------------------------------------------
def _gemm_bias_kernel(w_ref, p_ref, b_ref, o_ref, acc_ref):
    @pl.when(pl.program_id(1) == 0)
    def _init():
        acc_ref[...] = jnp.zeros_like(acc_ref)

    acc_ref[...] += jnp.dot(w_ref[...], p_ref[...],
                            preferred_element_type=jnp.float32)

    @pl.when(pl.program_id(1) == pl.num_programs(1) - 1)
    def _finalize():
        o_ref[...] = (acc_ref[...] + b_ref[...]).astype(o_ref.dtype)


def _gemm_nobias_kernel(w_ref, p_ref, o_ref, acc_ref):
    @pl.when(pl.program_id(1) == 0)
    def _init():
        acc_ref[...] = jnp.zeros_like(acc_ref)

    acc_ref[...] += jnp.dot(w_ref[...], p_ref[...],
                            preferred_element_type=jnp.float32)

    @pl.when(pl.program_id(1) == pl.num_programs(1) - 1)
    def _finalize():
        o_ref[...] = acc_ref[...].astype(o_ref.dtype)


def conv_gemm(w_mat, patches, bias=None, *, block_n=2048, block_k=512,
              compute_dtype=jnp.bfloat16, out_dtype=jnp.float32):
    """out = w_mat @ patches (+ bias[:, None]) with a lane-dense output.

    w_mat:   (C_out, K)   adapted conv weight, K ordered (c_in, k_h, k_w)
    patches: (K, M)       im2col matrix, M = N*Ho*Wo (lane-dense axis)
    bias:    (C_out,) or None
    """
    c_out, k = w_mat.shape
    k2, m = patches.shape
    assert k == k2, (w_mat.shape, patches.shape)

    # ---- padded / tiled sizes --------------------------------------------
    c_out_p = _round_up(c_out, 8)                       # output sublane dim
    k_p = _round_up(k, 128)                             # aligned contraction
    bk = min(_round_up(block_k, 128), k_p)
    k_pad = _round_up(k_p, bk)
    grid_k = k_pad // bk

    m_p = _round_up(m, 128)
    bn = min(_round_up(block_n, 128), m_p)
    if m_p > 128 and m_p // bn < 2:
        # keep the parallel grid >= 2 so both v7x TensorCores get work
        bn = max(128, _round_up(m_p // 2, 128))
    m_pad = _round_up(m_p, bn)
    grid_n = m_pad // bn

    # ---- zero-pad operands (zeros do not change the contraction) ---------
    w_p = jnp.zeros((c_out_p, k_pad), compute_dtype)
    w_p = w_p.at[:c_out, :k].set(w_mat.astype(compute_dtype))
    p_p = jnp.zeros((k_pad, m_pad), compute_dtype)
    p_p = p_p.at[:k, :m].set(patches.astype(compute_dtype))

    # ---- explicit VMEM budget (portable down to v7x's 64 MiB VMEM) -------
    in_b = jnp.dtype(compute_dtype).itemsize
    vmem_est = (2 * bn * bk * in_b            # double-buffered patches tile
                + 2 * c_out_p * bk * in_b     # double-buffered weight tile
                + 2 * c_out_p * 128 * 4       # bias tile (lane-padded)
                + 2 * c_out_p * bn * 4        # double-buffered output tile
                + c_out_p * bn * 4)           # fp32 accumulator scratch
    vmem_limit = int(min(max(4 * vmem_est, 8 * 2**20), 32 * 2**20))

    common = dict(
        out_shape=jax.ShapeDtypeStruct((c_out_p, m_pad), out_dtype),
        compiler_params=pltpu.CompilerParams(
            dimension_semantics=("parallel", "arbitrary"),
            vmem_limit_bytes=vmem_limit),
    )
    w_spec = pl.BlockSpec((c_out_p, bk), lambda j, kk: (0, kk))
    p_spec = pl.BlockSpec((bk, bn), lambda j, kk: (kk, j))
    o_spec = pl.BlockSpec((c_out_p, bn), lambda j, kk: (0, j))
    scratch = [pltpu.VMEM((c_out_p, bn), jnp.float32)]

    if bias is None:
        out = pl.pallas_call(
            _gemm_nobias_kernel,
            grid_spec=pltpu.PrefetchScalarGridSpec(
                num_scalar_prefetch=0, grid=(grid_n, grid_k),
                in_specs=[w_spec, p_spec], out_specs=o_spec,
                scratch_shapes=scratch),
            **common)(w_p, p_p)
    else:
        b_p = jnp.zeros((c_out_p, 1), jnp.float32)
        b_p = b_p.at[:c_out, 0].set(bias.astype(jnp.float32))
        b_spec = pl.BlockSpec((c_out_p, 1), lambda j, kk: (0, 0))
        out = pl.pallas_call(
            _gemm_bias_kernel,
            grid_spec=pltpu.PrefetchScalarGridSpec(
                num_scalar_prefetch=0, grid=(grid_n, grid_k),
                in_specs=[w_spec, p_spec, b_spec], out_specs=o_spec,
                scratch_shapes=scratch),
            **common)(w_p, p_p, b_p)

    return out[:c_out, :m]


# ---------------------------------------------------------------------------
# Plain-JAX glue (tiny permutations / layout only)
# ---------------------------------------------------------------------------
def shift(m):
    """shifted[r, c] = m[r, (c - r) % n_cols]  (torch.gather equivalent)."""
    n_rows, n_cols = m.shape
    row = jnp.arange(n_rows)[:, None]
    col = jnp.arange(n_cols)[None, :]
    return jnp.take_along_axis(m, (col - row) % n_cols, axis=1)


def _im2col_t(x, ksz, stride, padding):
    """NCHW -> (C_in*k*k, N*Ho*Wo); rows ordered (c_in, k_h, k_w), cols lane-dense."""
    n, c_in, h, w = x.shape
    h_out = (h + 2 * padding - ksz) // stride + 1
    w_out = (w + 2 * padding - ksz) // stride + 1
    xp = jnp.pad(x, ((0, 0), (0, 0), (padding, padding), (padding, padding)))
    pats = jnp.stack(
        [xp[:, :,
            i:i + stride * (h_out - 1) + 1:stride,
            j:j + stride * (w_out - 1) + 1:stride]
         for i in range(ksz) for j in range(ksz)],
        axis=0)                                    # (k*k, N, C_in, Ho, Wo)
    pats = pats.transpose(2, 0, 1, 3, 4)           # (C_in, k*k, N, Ho, Wo)
    return pats.reshape(c_in * ksz * ksz, n * h_out * w_out), h_out, w_out


# ---------------------------------------------------------------------------
# PostMult_LoRALayer.forward (Conv2d branch)
# ---------------------------------------------------------------------------
def postmult_lora_conv2d_forward(x, W, bias, A, B, stride=1, padding=1):
    c_out, c_in, ksz, _ = W.shape
    n = x.shape[0]

    # Weight adaptation: two ~KFLOP GEMMs + a 4x4 circular-shift permutation.
    # Kept in plain JAX so XLA fuses them; separate pallas_call launches would
    # cost more than the math (per perf review).
    BA_s = shift(B @ A)                                       # (C_in, C_in)
    adapted = (W.reshape(c_in, -1).T @ BA_s).reshape(W.shape)
    w_mat = adapted.reshape(c_out, c_in * ksz * ksz)          # (C_out, K)

    # Convolution as one lane-dense Pallas GEMM.
    # TODO(synk): an implicit-GEMM kernel (per-tile k*k row gather via manual
    # DMA) would remove the im2col HBM materialization entirely.
    patches, h_out, w_out = _im2col_t(x, ksz, stride, padding)
    y_flat = conv_gemm(w_mat, patches, bias)                  # (C_out, N*Ho*Wo)
    return y_flat.reshape(c_out, n, h_out, w_out).transpose(1, 0, 2, 3)


# ---------------------------------------------------------------------------
# Pure-JAX reference (independent of the Pallas path)
# ---------------------------------------------------------------------------
def reference_forward(x, W, bias, A, B, stride=1, padding=1):
    c_out, c_in, ksz, _ = W.shape
    BA_s = shift(jnp.matmul(B, A))
    adapted = (W.reshape(c_in, -1).T @ BA_s).reshape(W.shape)
    y = jax.lax.conv_general_dilated(
        x, adapted, window_strides=(stride, stride),
        padding=((padding, padding), (padding, padding)),
        dimension_numbers=("NCHW", "OIHW", "NCHW"))
    return y + bias[None, :, None, None]


if __name__ == "__main__":
    # Base layer: nn.Conv2d(4, 8, kernel_size=3, stride=1, padding=1), rank=4
    N_, C_in, H, Wd = 2, 4, 16, 16
    C_out, ksz, rank = 8, 3, 4
    stride, padding = 1, 1

    key = jax.random.PRNGKey(0)
    kW, kb, kB, kx = jax.random.split(key, 4)
    W = 0.1 * jax.random.normal(kW, (C_out, C_in, ksz, ksz), jnp.float32)
    bias = 0.1 * jax.random.normal(kb, (C_out,), jnp.float32)

    # reset_parameters(): B orthogonal (orthonormal rows), A = pinv(B)
    G = jax.random.normal(kB, (rank * ksz * ksz, C_in), jnp.float32)
    Q, _ = jnp.linalg.qr(G)                    # (r*k*k, C_in) orthonormal cols
    B = Q.T                                    # (C_in, r*k*k) orthonormal rows
    A = jnp.linalg.pinv(B)                     # (r*k*k, C_in)

    x = jax.random.normal(kx, (N_, C_in, H, Wd), jnp.float32)

    fwd = jax.jit(lambda x_, W_, b_, A_, B_: postmult_lora_conv2d_forward(
        x_, W_, b_, A_, B_, stride=stride, padding=padding))
    y = jax.block_until_ready(fwd(x, W, bias, A, B))

    y_ref = reference_forward(x, W, bias, A, B, stride=stride, padding=padding)
    if not jnp.allclose(y, y_ref, atol=5e-2, rtol=5e-2):
        err = float(jnp.max(jnp.abs(y - y_ref)))
        raise AssertionError(
            f"Pallas result mismatches JAX reference (max abs err {err})")
    print("KERNEL_OK")
</pallas_src>

<mosaic_0001>
module attributes {stable_mosaic.version = 11 : i64} {
  func.func @_gemm_bias_kernel(%arg0: i32, %arg1: i32, %arg2: memref<8x128xbf16, #tpu.memory_space<vmem>>, %arg3: memref<128x256xbf16, #tpu.memory_space<vmem>>, %arg4: memref<8x1xf32, #tpu.memory_space<vmem>>, %arg5: memref<8x256xf32, #tpu.memory_space<vmem>>, %arg6: memref<8x256xf32, #tpu.memory_space<vmem>>) attributes {dimension_semantics = [#tpu.dimension_semantics<parallel>, #tpu.dimension_semantics<arbitrary>], iteration_bounds = array<i64: 2, 1>, scalar_prefetch = 0 : i64, scratch_operands = 1 : i64, tpu.core_type = #tpu.core_type<tc>, window_params = [{transform_indices = @transform_0, window_bounds = array<i64: 8, 128>}, {transform_indices = @transform_1, window_bounds = array<i64: 128, 256>}, {pipeline_mode = #tpu.pipeline_mode<synchronous>, transform_indices = @transform_2, window_bounds = array<i64: 8, 1>}, {transform_indices = @transform_3, window_bounds = array<i64: 8, 256>}]} {
    %c0_i32 = arith.constant 0 : i32
    %0 = arith.cmpi eq, %arg1, %c0_i32 : i32
    %1 = arith.extui %0 : i1 to i32
    %c0_i32_0 = arith.constant 0 : i32
    %2 = arith.cmpi ne, %1, %c0_i32_0 : i32
    scf.if %2 {
      %cst_10 = arith.constant 0.000000e+00 : f32
      %12 = vector.broadcast %cst_10 : f32 to vector<8x256xf32>
      %c0_11 = arith.constant 0 : index
      %c0_12 = arith.constant 0 : index
      %13 = vector.load %arg6[%c0_11, %c0_12] : memref<8x256xf32, #tpu.memory_space<vmem>>, vector<8x256xf32>
      tpu.vector_store %arg6[%c0_11, %c0_12], %12 {strides = array<i32>} : memref<8x256xf32, #tpu.memory_space<vmem>>, vector<8x256xf32>,
    } else {
    }
    %c0 = arith.constant 0 : index
    %c0_1 = arith.constant 0 : index
    %3 = vector.load %arg6[%c0, %c0_1] : memref<8x256xf32, #tpu.memory_space<vmem>>, vector<8x256xf32>
    %c0_2 = arith.constant 0 : index
    %c0_3 = arith.constant 0 : index
    %4 = vector.load %arg2[%c0_2, %c0_3] : memref<8x128xbf16, #tpu.memory_space<vmem>>, vector<8x128xbf16>
    %c0_4 = arith.constant 0 : index
    %c0_5 = arith.constant 0 : index
    %5 = vector.load %arg3[%c0_4, %c0_5] : memref<128x256xbf16, #tpu.memory_space<vmem>>, vector<128x256xbf16>
    %cst = arith.constant dense<0.000000e+00> : vector<8x256xf32>
    %6 = tpu.matmul %4, %5, %cst {dimension_numbers = #tpu.dot_dimension_numbers<[1], [0], [0], [1], [0, 0, 1, 1], [], []>} : vector<8x128xbf16>, vector<128x256xbf16>, vector<8x256xf32> -> vector<8x256xf32>
    %7 = arith.addf %3, %6 : vector<8x256xf32>
    %c0_6 = arith.constant 0 : index
    %c0_7 = arith.constant 0 : index
    %8 = vector.load %arg6[%c0_6, %c0_7] : memref<8x256xf32, #tpu.memory_space<vmem>>, vector<8x256xf32>
    tpu.vector_store %arg6[%c0_6, %c0_7], %7 {strides = array<i32>} : memref<8x256xf32, #tpu.memory_space<vmem>>, vector<8x256xf32>,
    %c0_i32_8 = arith.constant 0 : i32
    %9 = arith.cmpi eq, %arg1, %c0_i32_8 : i32
    %10 = arith.extui %9 : i1 to i32
    %c0_i32_9 = arith.constant 0 : i32
    %11 = arith.cmpi ne, %10, %c0_i32_9 : i32
    scf.if %11 {
      %c0_10 = arith.constant 0 : index
      %c0_11 = arith.constant 0 : index
      %12 = vector.load %arg6[%c0_10, %c0_11] : memref<8x256xf32, #tpu.memory_space<vmem>>, vector<8x256xf32>
      %c0_12 = arith.constant 0 : index
      %c0_13 = arith.constant 0 : index
      %13 = vector.load %arg4[%c0_12, %c0_13] : memref<8x1xf32, #tpu.memory_space<vmem>>, vector<8x1xf32>
      %14 = vector.broadcast %13 : vector<8x1xf32> to vector<8x256xf32>
      %15 = arith.addf %12, %14 : vector<8x256xf32>
      %c0_14 = arith.constant 0 : index
      %c0_15 = arith.constant 0 : index
      %16 = vector.load %arg5[%c0_14, %c0_15] : memref<8x256xf32, #tpu.memory_space<vmem>>, vector<8x256xf32>
      tpu.vector_store %arg5[%c0_14, %c0_15], %15 {strides = array<i32>} : memref<8x256xf32, #tpu.memory_space<vmem>>, vector<8x256xf32>,
    } else {
    }
    return
  }
  func.func @transform_0(%arg0: i32, %arg1: i32) -> (i32, i32) {
    %c0_i32 = arith.constant 0 : i32
    %c0_i32_0 = arith.constant 0 : i32
    return %c0_i32, %arg1 : i32, i32
  }
  func.func @transform_1(%arg0: i32, %arg1: i32) -> (i32, i32) {
    %c0_i32 = arith.constant 0 : i32
    return %arg1, %arg0 : i32, i32
  }
  func.func @transform_2(%arg0: i32, %arg1: i32) -> (i32, i32) {
    %c0_i32 = arith.constant 0 : i32
    %c0_i32_0 = arith.constant 0 : i32
    %c0_i32_1 = arith.constant 0 : i32
    return %c0_i32, %c0_i32_0 : i32, i32
  }
  func.func @transform_3(%arg0: i32, %arg1: i32) -> (i32, i32) {
    %c0_i32 = arith.constant 0 : i32
    %c0_i32_0 = arith.constant 0 : i32
    return %c0_i32, %arg0 : i32, i32
  }
}

</mosaic_0001>

<bundles_post_ra>
// kernel: _lambda_.1
= control target key start
LH: loop header
LB: loop body
LE: loop exit
PB: predicated region body
PF: predicated region fallthrough
CT: control target
= control target key end

     0   :  { %s717_s12 = smov 0   ;;  %s719_s13 = smov 0   ;;  %s806_s0 = inlined_call_operand.vmem [shape: bf16[8,128], index: 0, kind: input, shape index: {}]   ;;  %s807_s1 = inlined_call_operand.vmem [shape: bf16[128,512], index: 1, kind: input, shape index: {}]   ;;  %s808_s2 = inlined_call_operand.vmem [shape: f32[8,1], index: 2, kind: input, shape index: {}]   ;;  %s809_s3 = inlined_call_operand.vmem [shape: f32[8,512], index: 3, kind: output, shape index: {}]  }
   0x1   :  { %s721_s14 = smov 0   ;;  %s723_s15 = smov 0  }
   0x2   :  { %s725_s16 = smov 0  }
   0x3 LB: > { %s25_s17 = sadd.s32 1, %s690_s15  ;;  %p67_p1 = scmp.ne.s32.totalorder %s682_s13, %s678_s12  ;;  %s694_s16 = sphi %s725_s16, %s13_s16   ;;  %s690_s15 = sphi %s723_s15, %s813_s15   ;;  %s686_s14 = sphi %s721_s14, %s812_s14   ;;  %s682_s13 = sphi %s719_s13, %s811_s13   ;;  %s678_s12 = sphi %s717_s12, %s810_s12  }
   0x4   : > { %p27_p0 = scmp.ge.s32.totalorder %s25_s17, 2  ;;  %p68_p2 = scmp.eq.s32.totalorder %s694_s16, 0 }
   0x5   : > { %s60_s19 = sadd.s32 1, %s682_s13  ;;  %p563_p5 = scmp.ge.s32.totalorder %s694_s16, 2 }
   0x6   : > { %s815_s17 = smov (%p27_p0, %s25_s17), 0  ;;  %p69_p3 = por %p68_p2, %p67_p1 }
   0x7   : > { %s56_s18 = ssub.s32 %s690_s15, %s815_s17  ;;  %150 = sbr.rel (%p563_p5) target bundleno = 24 (0x18), region = 24 }
   0x8   : > { %p58_p4 = scmp.eq.s32.totalorder %s56_s18, 0 }
   0xa   : > { %s752_s20 = scalar_select %p58_p4, %s682_s13, %s60_s19  }
   0xc   : > { %153 = sbr.rel (!%p69_p3) target bundleno = 24 (0x18), region = 28  ;;  %s155_s21 = sand.u32 (%p69_p3), 1, %s682_s13  }
   0xd   : > { %s589_s22 = sshll.u32 (%p69_p3), %s690_s15, 3  ;;  %s564_s23 = sshll.u32 (%p69_p3), %s155_s21, 7 }
   0xe   : > { %s760_s26 = scalar_lea.vmem (%p69_p3), %s807_s1, %s589_s22  ;;  %s157_s27 = scalar_lea.vmem (%p69_p3), [#allocation3], %s564_s23 }
   0xf   : > { %v222_v0 = vld [vmem:[%s760_s26] sm:$0xff] (%p69_p3)  ;;  %v224_v1 = vld [vmem:[%s760_s26 + $0x10] sm:$0xff] (%p69_p3) }
  0x10   : > { %v226_v2 = vld [vmem:[%s760_s26 + $0x20] sm:$0xff] (%p69_p3)  ;;  %223 = vst [vmem:[%s157_s27] sm:$0xff] (%p69_p3), %v222_v0  ;;  %225 = vst [vmem:[%s157_s27 + $0x8] sm:$0xff] (%p69_p3), %v224_v1  ;;  %v228_v3 = vld [vmem:[%s760_s26 + $0x30] sm:$0xff] (%p69_p3) }
  0x11   : > { %227 = vst [vmem:[%s157_s27 + $0x10] sm:$0xff] %v226_v2  ;;  %v230_v4 = vld [vmem:[%s760_s26 + $0x40] sm:$0xff]  ;;  %v232_v5 = vld [vmem:[%s760_s26 + $0x50] sm:$0xff]  ;;  %229 = vst [vmem:[%s157_s27 + $0x18] sm:$0xff] %v228_v3 }
  0x12   : > { %231 = vst [vmem:[%s157_s27 + $0x20] sm:$0xff] %v230_v4  ;;  %233 = vst [vmem:[%s157_s27 + $0x28] sm:$0xff] %v232_v5  ;;  %v234_v6 = vld [vmem:[%s760_s26 + $0x60] sm:$0xff]  ;;  %v236_v7 = vld [vmem:[%s760_s26 + $0x70] sm:$0xff] }
  0x13   : > { %v238_v8 = vld [vmem:[%s760_s26 + $0x80] sm:$0xff]  ;;  %235 = vst [vmem:[%s157_s27 + $0x30] sm:$0xff] %v234_v6  ;;  %237 = vst [vmem:[%s157_s27 + $0x38] sm:$0xff] %v236_v7  ;;  %v240_v9 = vld [vmem:[%s760_s26 + $0x90] sm:$0xff] }
  0x14   : > { %239 = vst [vmem:[%s157_s27 + $0x40] sm:$0xff] %v238_v8  ;;  %v242_v10 = vld [vmem:[%s760_s26 + $0xa0] sm:$0xff]  ;;  %v244_v11 = vld [vmem:[%s760_s26 + $0xb0] sm:$0xff]  ;;  %241 = vst [vmem:[%s157_s27 + $0x48] sm:$0xff] %v240_v9 }
  0x15   : > { %243 = vst [vmem:[%s157_s27 + $0x50] sm:$0xff] %v242_v10  ;;  %245 = vst [vmem:[%s157_s27 + $0x58] sm:$0xff] %v244_v11  ;;  %v246_v12 = vld [vmem:[%s760_s26 + $0xc0] sm:$0xff]  ;;  %v248_v13 = vld [vmem:[%s760_s26 + $0xd0] sm:$0xff] }
  0x16   : > { %v250_v14 = vld [vmem:[%s760_s26 + $0xe0] sm:$0xff]  ;;  %247 = vst [vmem:[%s157_s27 + $0x60] sm:$0xff] %v246_v12  ;;  %249 = vst [vmem:[%s157_s27 + $0x68] sm:$0xff] %v248_v13  ;;  %v252_v15 = vld [vmem:[%s760_s26 + $0xf0] sm:$0xff] }
  0x17   : > { %251 = vst [vmem:[%s157_s27 + $0x70] sm:$0xff] %v250_v14  ;;  %253 = vst [vmem:[%s157_s27 + $0x78] sm:$0xff] %v252_v15 }
  0x18 PF: > { %p567_p6 = scmp.ge.s32.totalorder %s694_s16, 1  ;;  %p258_p7 = scmp.lt.s32.totalorder %s694_s16, 3 }
  0x1a   : > { %p259_p8 = pnand %p567_p6, %p258_p7 }
  0x1b   : > { %s265_s28 = sand.u32 (!%p259_p8), 1, %s678_s12   ;;  %s569_s8 = sshll.u32 (!%p259_p8), %s686_s14, 1 }
  0x1c   : > { %262 = sbr.rel (%p259_p8) target bundleno = 266 (0x10a), region = 66  ;;  %s568_s4 = sshll.u32 (!%p259_p8), %s265_s28, 7 }
  0x1d   : > { %s267_s5 = scalar_lea.vmem (!%p259_p8), [#allocation3], %s568_s4  ;;  %p299_p9 = scmp.lt.s32.totalorder (!%p259_p8), %s569_s8, 3 }
  0x21   : > { %v460_v16 = vld [vmem:[%s808_s2] sm:$0xff]  ;;  %v696_v17 = vmov 0   ;;  %v632_v18 = vld [vmem:[%s267_s5 + $0x74] ss:$8 sps:$4 sm:$0xff]   ;;  %v634_v19 = vld [vmem:[%s267_s5 + $0x70] ss:$8 sps:$4 sm:$0xff]  }
  0x22   : > { %442 = vmatprep.mubr.bf16.mxu0 %v696_v17  ;;  %631 = vset.pattern.permute.xlu0 %v696_v17  ;;  %v635_v20 = vld [vmem:[%s267_s5 + $0x64] ss:$8 sps:$4 sm:$0xff]   ;;  %v637_v21 = vld [vmem:[%s267_s5 + $0x60] ss:$8 sps:$4 sm:$0xff]   ;;  %v638_v22 = vld [vmem:[%s267_s5 + $0x54] ss:$8 sps:$4 sm:$0xff]  }
  0x23   : > { %463 = vperm.xlu0 %631, %v460_v16   ;;  %410 = vmatprep.subr.bf16.mxu0 %v632_v18  ;;  %v640_v23 = vld [vmem:[%s267_s5 + $0x50] ss:$8 sps:$4 sm:$0xff]   ;;  %v641_v24 = vld [vmem:[%s267_s5 + $0x44] ss:$8 sps:$4 sm:$0xff]   ;;  %v643_v25 = vld [vmem:[%s267_s5 + $0x40] ss:$8 sps:$4 sm:$0xff]  }
  0x24   : > { %411 = vmatpush1.bf16.msra.mxu0 %v634_v19  ;;  %v644_v26 = vld [vmem:[%s267_s5 + $0x34] ss:$8 sps:$4 sm:$0xff]   ;;  %v646_v27 = vld [vmem:[%s267_s5 + $0x30] ss:$8 sps:$4 sm:$0xff]   ;;  %v647_v28 = vld [vmem:[%s267_s5 + $0x24] ss:$8 sps:$4 sm:$0xff]  }
  0x25   : > { %412 = vmatprep.subr.bf16.mxu0 %v635_v20  ;;  %v649_v29 = vld [vmem:[%s267_s5 + $0x20] ss:$8 sps:$4 sm:$0xff]   ;;  %v650_v30 = vld [vmem:[%s267_s5 + $0x14] ss:$8 sps:$4 sm:$0xff]   ;;  %v652_v31 = vld [vmem:[%s267_s5 + $0x10] ss:$8 sps:$4 sm:$0xff]  }
  0x26   : > { %v653_v32 = vld [vmem:[%s267_s5 + $0x4] ss:$8 sps:$4 sm:$0xff]   ;;  %v655_v33 = vld [vmem:[%s267_s5] ss:$8 sps:$4 sm:$0xff]   ;;  %s817_s8 = smov (!%p299_p9, %s569_s8), 3 }
  0x27   : > { %v313_v34 = vld [vmem:[%s806_s0] sm:$0xf]  ;;  %s570_s9 = sshll.u32 %s817_s8, 3 }
  0x28   : > { %413 = vmatpush1.bf16.msra.mxu0 %v637_v21  ;;  %s302_s12 = scalar_lea.vmem %s809_s3, %s570_s9 }
  0x29   : > { %414 = vmatprep.subr.bf16.mxu0 %v638_v22 }
  0x2c   : > { %415 = vmatpush1.bf16.msra.mxu0 %v640_v23 }
  0x2d   : > { %416 = vmatprep.subr.bf16.mxu0 %v641_v24 }
  0x30   : > { %417 = vmatpush1.bf16.msra.mxu0 %v643_v25 }
  0x31   : > { %418 = vmatprep.subr.bf16.mxu0 %v644_v26 }
  0x34   : > { %419 = vmatpush1.bf16.msra.mxu0 %v646_v27 }
  0x35   : > { %420 = vmatprep.subr.bf16.mxu0 %v647_v28 }
  0x38   : > { %421 = vmatpush1.bf16.msra.mxu0 %v649_v29 }
  0x39   : > { %422 = vmatprep.subr.bf16.mxu0 %v650_v30 }
  0x3c   : > { %423 = vmatpush1.bf16.msra.mxu0 %v652_v31 }
  0x3d   : > { %424 = vmatprep.subr.bf16.mxu0 %v653_v32 }
  0x40   : > { %425 = vmatpush1.bf16.msra.mxu0 %v655_v33 }
  0x43   : > { %443 = vmatmul.mubr.bf16.vlgmr.msra.gmra.mxu0 %v313_v34 }
  0x9e   : > { %v464_v35 = vpop.permute.xlu0 %463 }
 0x103   : > { %v444_v36 = vpop.f32.mrf.mxu0 }
 0x104   : > { %v466_v37 = vadd.f32 %v464_v35, %v444_v36 }
 0x105   : > { %v446_v38 = vpop.f32.mrf.mxu0 }
 0x106   : > { %468 = vst [vmem:[%s302_s12] sm:$0xff] %v466_v37  ;;  %v467_v39 = vadd.f32 %v464_v35, %v446_v38 }
 0x107   : > { %v448_v40 = vpop.f32.mrf.mxu0 }
 0x108   : > { %469 = vst [vmem:[%s302_s12 + $0x8] sm:$0xff] %v467_v39 }
 0x109   : > { %v449_v41 = vpop.f32.mrf.mxu0 }
 0x10a PF: > { %s13_s16 = sadd.s32 1, %s694_s16   ;;  %s810_s12 = smov %s682_s13 }
 0x10b   : > { %p10_p10 = scmp.ge.s32.totalorder %s13_s16, 4   ;;  %s811_s13 = smov %s752_s20 }
 0x10c   : > { %s812_s14 = smov %s690_s15  ;;  %s813_s15 = smov %s815_s17 }
 0x10d   :  { %12 = sbr.rel (!%p10_p10) target bundleno = 3 (0x3), region = 116 }

</bundles_post_ra>
